<compile_context>
chip_gen: v7x
topology: tpu7x:2x2x1
jax: 0.10.0
libtpu: 0.0.40
codegen_flags: <defaults>
</compile_context>

<pallas_src>
from functools import partial

import jax
import jax.numpy as jnp
from jax.experimental import pallas as pl
from jax.experimental.pallas import tpu as pltpu


def critic_kernel(
    xa_ref,                 # [5, TB]   [state; action; ones], batch on lanes
    we_ref,                 # [128, 5]  fused block-diagonal encoder weight + bias col
    w1_ref, b1_ref,         # [32, 128] (f32 or bf16), [32, 1]  q hidden layer
    w2_ref, b2_ref,         # [32, 1],  [1, 1]                  q output layer
    o_ref,                  # [1, TB]
    *, emb_dtype,
):
    xa = xa_ref[...]

    # Fused encoders, bias folded into the matmul via the ones-row: ReLU(We @ xa).
    emb = jnp.maximum(
        jnp.dot(we_ref[...], xa, preferred_element_type=jnp.float32), 0.0
    )                                                                  # [128, TB] f32

    # Cast emb once (bf16 by default) -> halves the VMEM writeback of the only large
    # intermediate and lets the K=128 matmul run as a single bf16 MXU pass.
    emb = emb.astype(emb_dtype)

    # q_estimator hidden layer: [32,128] @ [128,TB] + bias, ReLU (f32 accumulate).
    h = jnp.maximum(
        jnp.dot(w1_ref[...], emb, preferred_element_type=jnp.float32) + b1_ref[...],
        0.0,
    )                                                                  # [32, TB] f32

    # q_estimator output layer (32 -> 1): elementwise mul + sublane reduce
    # (kept off the MXU on purpose; VPU/XLU have slack here).
    q = jnp.sum(h * w2_ref[...], axis=0, keepdims=True) + b2_ref[...]  # [1, TB]
    o_ref[...] = q.astype(o_ref.dtype)


def pack_params(params):
    """One-time parameter packing into the kernel's W @ X layout (call at init)."""
    ws, bs, wa, ba, w1, b1, w2, b2 = params

    # Fused block-diagonal encoder weight with the bias folded in as column 4:
    #   rows 0..63  : state encoder  (acts on xa rows 0..2)
    #   rows 64..127: action encoder (acts on xa row 3)
    #   column 4    : [bs; ba]       (acts on the ones row of xa)
    we_t = jnp.zeros((128, 5), jnp.float32)
    we_t = we_t.at[:64, :3].set(ws.T)
    we_t = we_t.at[64:, 3:4].set(wa.T)
    we_t = we_t.at[:, 4:5].set(jnp.concatenate([bs, ba], axis=-1).T)

    w1_t = w1.T.astype(jnp.float32)                  # [32, 128]
    b1_t = b1.T.astype(jnp.float32)                  # [32, 1]
    w2_c = w2.reshape(32, 1).astype(jnp.float32)     # [32, 1] (mul + reduce form)
    b2_c = b2.reshape(1, 1).astype(jnp.float32)      # [1, 1]
    return (we_t, w1_t, b1_t, w2_c, b2_c)


@partial(jax.jit, static_argnames=("block_b", "use_bf16"))
def critic_forward(x, a, packed, *, block_b=16384, use_bf16=True):
    """q(x, a) with x: [B, 3], a: [B, 1]. Returns [B, 1] float32."""
    B = x.shape[0]
    we_t, w1_t, b1_t, w2_c, b2_c = packed

    emb_dtype = jnp.bfloat16 if use_bf16 else jnp.float32
    w1_k = w1_t.astype(emb_dtype)   # tiny [32,128] cast; weights otherwise pre-packed

    # Batch on lanes, ones-row appended for the folded encoder bias: [5, B].
    ones = jnp.ones((B, 1), jnp.float32)
    xa_t = jnp.concatenate(
        [x.astype(jnp.float32), a.astype(jnp.float32), ones], axis=-1
    ).T

    # ---- batch tiling ------------------------------------------------------
    # Big tiles to amortize the ~0.35us per-grid-step overhead; for large B make
    # sure there are >= 2 grid steps so the "parallel" axis feeds both v7x TCs.
    tb = min(block_b, B)
    tb = min(tb, 32768)                       # VMEM working-set cap (v7x: 64 MiB/TC)
    if B >= 1024:
        half = ((pl.cdiv(B, 2) + 127) // 128) * 128
        tb = min(tb, half)
    if tb < B:
        tb = max(128, (tb // 128) * 128)      # lane tiles must be multiples of 128
    grid_b = pl.cdiv(B, tb)

    const = lambda i: (0, 0)   # resident operands: fetched once, reused every step
    out_t = pl.pallas_call(
        partial(critic_kernel, emb_dtype=emb_dtype),
        out_shape=jax.ShapeDtypeStruct((1, B), jnp.float32),
        grid=(grid_b,),
        in_specs=[
            pl.BlockSpec((5, tb), lambda i: (0, i)),   # xa, tiled over batch lanes
            pl.BlockSpec((128, 5), const),             # fused encoder weight (+bias)
            pl.BlockSpec((32, 128), const),            # q L1 weight (f32 or bf16)
            pl.BlockSpec((32, 1), const),              # q L1 bias
            pl.BlockSpec((32, 1), const),              # q L2 weight (column)
            pl.BlockSpec((1, 1), const),               # q L2 bias
        ],
        out_specs=pl.BlockSpec((1, tb), lambda i: (0, i)),
        compiler_params=pltpu.CompilerParams(
            dimension_semantics=("parallel",),         # shard batch across TCs
            vmem_limit_bytes=32 * 1024 * 1024,         # safe on v5e/v6e/v7x
        ),
    )(xa_t, we_t, w1_k, b1_t, w2_c, b2_c)

    return out_t.T   # [B, 1], matching the PyTorch module's output layout


def init_params(key):
    """Deterministic synthetic parameters matching the PyTorch module shapes."""
    ks = jax.random.split(key, 8)

    def lin(k, fan_in, fan_out):
        bound = 1.0 / jnp.sqrt(fan_in)
        kw, kb = jax.random.split(k)
        w = jax.random.uniform(kw, (fan_in, fan_out), jnp.float32, -bound, bound)
        b = jax.random.uniform(kb, (1, fan_out), jnp.float32, -bound, bound)
        return w, b

    ws, bs = lin(ks[0], 3, 64)      # state_encoder  Linear(3, 64)
    wa, ba = lin(ks[1], 1, 64)      # action_encoder Linear(1, 64)
    w1, b1 = lin(ks[2], 128, 32)    # q_estimator    Linear(128, 32)
    w2, b2 = lin(ks[3], 32, 1)      # q_estimator    Linear(32, 1)
    return (ws, bs, wa, ba, w1, b1, w2, b2)


def critic_ref(x, a, params):
    """Plain-JAX reference for correctness checking."""
    (ws, bs, wa, ba, w1, b1, w2, b2) = params
    hs = jnp.maximum(x @ ws + bs, 0.0)
    ha = jnp.maximum(a @ wa + ba, 0.0)
    emb = jnp.concatenate([hs, ha], axis=-1)
    h = jnp.maximum(emb @ w1 + b1, 0.0)
    return h @ w2 + b2


if __name__ == "__main__":
    key = jax.random.PRNGKey(0)
    k_x, k_a, k_p, k_x2, k_a2, k_x3, k_a3 = jax.random.split(key, 7)
    params = init_params(k_p)
    packed = pack_params(params)   # packed once, outside the per-call path

    # Small demo batch (single block, grid of 1).
    B = 8
    x = jax.random.normal(k_x, (B, 3), jnp.float32)   # state:  [B, 3]
    a = jax.random.normal(k_a, (B, 1), jnp.float32)   # action: [B, 1]
    q_ref = critic_ref(x, a, params)

    # f32 path: bit-accurate vs. reference.
    q_f32 = jax.block_until_ready(critic_forward(x, a, packed, use_bf16=False))
    assert q_f32.shape == (B, 1)
    assert jnp.allclose(q_f32, q_ref, atol=1e-5, rtol=1e-5), "f32 mismatch (B=8)"

    # Default bf16-emb path: looser tolerance (bf16 operands, f32 accumulation).
    q_bf = jax.block_until_ready(critic_forward(x, a, packed))
    assert q_bf.shape == (B, 1)
    assert jnp.allclose(q_bf, q_ref, atol=5e-2, rtol=5e-2), "bf16 mismatch (B=8)"

    # Larger batch exercising the multi-step grid + partial last tile.
    B2 = 640
    x2 = jax.random.normal(k_x2, (B2, 3), jnp.float32)
    a2 = jax.random.normal(k_a2, (B2, 1), jnp.float32)
    q2 = jax.block_until_ready(critic_forward(x2, a2, packed, block_b=256))
    q2_ref = critic_ref(x2, a2, params)
    assert q2.shape == (B2, 1)
    assert jnp.allclose(q2, q2_ref, atol=5e-2, rtol=5e-2), "mismatch (B=640)"

    # Batch large enough to trigger the >=2-step megacore split with default tiles.
    B3 = 2048
    x3 = jax.random.normal(k_x3, (B3, 3), jnp.float32)
    a3 = jax.random.normal(k_a3, (B3, 1), jnp.float32)
    q3 = jax.block_until_ready(critic_forward(x3, a3, packed))
    q3_ref = critic_ref(x3, a3, params)
    assert q3.shape == (B3, 1)
    assert jnp.allclose(q3, q3_ref, atol=5e-2, rtol=5e-2), "mismatch (B=2048)"

    print("KERNEL_OK")
</pallas_src>

<mosaic_0001>
module attributes {stable_mosaic.version = 11 : i64} {
  func.func @critic_kernel(%arg0: i32, %arg1: memref<5x8xf32, #tpu.memory_space<vmem>>, %arg2: memref<128x5xf32, #tpu.memory_space<vmem>>, %arg3: memref<32x128xf32, #tpu.memory_space<vmem>>, %arg4: memref<32x1xf32, #tpu.memory_space<vmem>>, %arg5: memref<32x1xf32, #tpu.memory_space<vmem>>, %arg6: memref<1x1xf32, #tpu.memory_space<vmem>>, %arg7: memref<1x8xf32, #tpu.memory_space<vmem>>) attributes {dimension_semantics = [#tpu.dimension_semantics<parallel>], iteration_bounds = array<i64: 1>, scalar_prefetch = 0 : i64, scratch_operands = 0 : i64, tpu.core_type = #tpu.core_type<tc>, window_params = [{transform_indices = @transform_0, window_bounds = array<i64: 5, 8>}, {pipeline_mode = #tpu.pipeline_mode<synchronous>, transform_indices = @transform_1, window_bounds = array<i64: 128, 5>}, {pipeline_mode = #tpu.pipeline_mode<synchronous>, transform_indices = @transform_2, window_bounds = array<i64: 32, 128>}, {pipeline_mode = #tpu.pipeline_mode<synchronous>, transform_indices = @transform_3, window_bounds = array<i64: 32, 1>}, {pipeline_mode = #tpu.pipeline_mode<synchronous>, transform_indices = @transform_4, window_bounds = array<i64: 32, 1>}, {pipeline_mode = #tpu.pipeline_mode<synchronous>, transform_indices = @transform_5, window_bounds = array<i64: 1, 1>}, {transform_indices = @transform_6, window_bounds = array<i64: 1, 8>}]} {
    %c0 = arith.constant 0 : index
    %c0_0 = arith.constant 0 : index
    %0 = vector.load %arg1[%c0, %c0_0] : memref<5x8xf32, #tpu.memory_space<vmem>>, vector<5x8xf32>
    %c0_1 = arith.constant 0 : index
    %c0_2 = arith.constant 0 : index
    %1 = vector.load %arg2[%c0_1, %c0_2] : memref<128x5xf32, #tpu.memory_space<vmem>>, vector<128x5xf32>
    %cst = arith.constant dense<0.000000e+00> : vector<128x8xf32>
    %2 = tpu.matmul %1, %0, %cst {dimension_numbers = #tpu.dot_dimension_numbers<[1], [0], [0], [1], [0, 0, 1, 1], [], []>} : vector<128x5xf32>, vector<5x8xf32>, vector<128x8xf32> -> vector<128x8xf32>
    %cst_3 = arith.constant 0.000000e+00 : f32
    %3 = vector.broadcast %cst_3 : f32 to vector<128x8xf32>
    %4 = arith.maximumf %2, %3 : vector<128x8xf32>
    %c0_4 = arith.constant 0 : index
    %c0_5 = arith.constant 0 : index
    %5 = vector.load %arg3[%c0_4, %c0_5] : memref<32x128xf32, #tpu.memory_space<vmem>>, vector<32x128xf32>
    %cst_6 = arith.constant dense<0.000000e+00> : vector<32x8xf32>
    %6 = tpu.matmul %5, %4, %cst_6 {dimension_numbers = #tpu.dot_dimension_numbers<[1], [0], [0], [1], [0, 0, 1, 1], [], []>} : vector<32x128xf32>, vector<128x8xf32>, vector<32x8xf32> -> vector<32x8xf32>
    %c0_7 = arith.constant 0 : index
    %c0_8 = arith.constant 0 : index
    %7 = vector.load %arg4[%c0_7, %c0_8] : memref<32x1xf32, #tpu.memory_space<vmem>>, vector<32x1xf32>
    %8 = vector.broadcast %7 : vector<32x1xf32> to vector<32x8xf32>
    %9 = arith.addf %6, %8 : vector<32x8xf32>
    %cst_9 = arith.constant 0.000000e+00 : f32
    %10 = vector.broadcast %cst_9 : f32 to vector<32x8xf32>
    %11 = arith.maximumf %9, %10 : vector<32x8xf32>
    %c0_10 = arith.constant 0 : index
    %c0_11 = arith.constant 0 : index
    %12 = vector.load %arg5[%c0_10, %c0_11] : memref<32x1xf32, #tpu.memory_space<vmem>>, vector<32x1xf32>
    %13 = vector.broadcast %12 : vector<32x1xf32> to vector<32x8xf32>
    %14 = arith.mulf %11, %13 : vector<32x8xf32>
    %cst_12 = arith.constant dense<0.000000e+00> : vector<8xf32>
    %15 = vector.multi_reduction <add>, %14, %cst_12 [0] : vector<32x8xf32> to vector<8xf32>
    %16 = vector.shape_cast %15 : vector<8xf32> to vector<1x8xf32>
    %c0_13 = arith.constant 0 : index
    %c0_14 = arith.constant 0 : index
    %17 = vector.load %arg6[%c0_13, %c0_14] : memref<1x1xf32, #tpu.memory_space<vmem>>, vector<1x1xf32>
    %18 = vector.broadcast %17 : vector<1x1xf32> to vector<1x8xf32>
    %19 = arith.addf %16, %18 : vector<1x8xf32>
    %c0_15 = arith.constant 0 : index
    %c0_16 = arith.constant 0 : index
    %20 = vector.load %arg7[%c0_15, %c0_16] : memref<1x8xf32, #tpu.memory_space<vmem>>, vector<1x8xf32>
    tpu.vector_store %arg7[%c0_15, %c0_16], %19 {strides = array<i32>} : memref<1x8xf32, #tpu.memory_space<vmem>>, vector<1x8xf32>,
    return
  }
  func.func @transform_0(%arg0: i32) -> (i32, i32) {
    %c0_i32 = arith.constant 0 : i32
    %c0_i32_0 = arith.constant 0 : i32
    return %c0_i32, %arg0 : i32, i32
  }
  func.func @transform_1(%arg0: i32) -> (i32, i32) {
    %c0_i32 = arith.constant 0 : i32
    %c0_i32_0 = arith.constant 0 : i32
    %c0_i32_1 = arith.constant 0 : i32
    return %c0_i32, %c0_i32_0 : i32, i32
  }
  func.func @transform_2(%arg0: i32) -> (i32, i32) {
    %c0_i32 = arith.constant 0 : i32
    %c0_i32_0 = arith.constant 0 : i32
    %c0_i32_1 = arith.constant 0 : i32
    return %c0_i32, %c0_i32_0 : i32, i32
  }
  func.func @transform_3(%arg0: i32) -> (i32, i32) {
    %c0_i32 = arith.constant 0 : i32
    %c0_i32_0 = arith.constant 0 : i32
    %c0_i32_1 = arith.constant 0 : i32
    return %c0_i32, %c0_i32_0 : i32, i32
  }
  func.func @transform_4(%arg0: i32) -> (i32, i32) {
    %c0_i32 = arith.constant 0 : i32
    %c0_i32_0 = arith.constant 0 : i32
    %c0_i32_1 = arith.constant 0 : i32
    return %c0_i32, %c0_i32_0 : i32, i32
  }
  func.func @transform_5(%arg0: i32) -> (i32, i32) {
    %c0_i32 = arith.constant 0 : i32
    %c0_i32_0 = arith.constant 0 : i32
    %c0_i32_1 = arith.constant 0 : i32
    return %c0_i32, %c0_i32_0 : i32, i32
  }
  func.func @transform_6(%arg0: i32) -> (i32, i32) {
    %c0_i32 = arith.constant 0 : i32
    %c0_i32_0 = arith.constant 0 : i32
    return %c0_i32, %arg0 : i32, i32
  }
}

</mosaic_0001>

<bundles_post_ra>
// kernel: critic_forward.1
= control target key start
LH: loop header
LB: loop body
LE: loop exit
PB: predicated region body
PF: predicated region fallthrough
CT: control target
= control target key end

     0   :  { %s792_s0 = inlined_call_operand.vmem [shape: f32[5,8], index: 0, kind: input, shape index: {}]   ;;  %s793_s1 = inlined_call_operand.vmem [shape: f32[128,5], index: 1, kind: input, shape index: {}]   ;;  %s794_s2 = inlined_call_operand.vmem [shape: f32[32,128], index: 2, kind: input, shape index: {}]   ;;  %s795_s3 = inlined_call_operand.vmem [shape: f32[32,1], index: 3, kind: input, shape index: {}]   ;;  %s796_s4 = inlined_call_operand.vmem [shape: f32[32,1], index: 4, kind: input, shape index: {}]   ;;  %s797_s5 = inlined_call_operand.<no memory space> [shape: f32[1,1], index: 5, kind: input, shape index: {}]   ;;  %s798_s6 = inlined_call_operand.hbm [shape: f32[1,8], index: 6, kind: output, shape index: {}]  }
   0x1   :  { %v11_v0 = vstv %s797_s5 }
   0x2   :  { %12 = vst [vmem:[#allocation2] sm:$0x1] %v11_v0 }
   0x3   :  { %v26_v1 = vld [vmem:[%s792_s0] sm:$0x1f]  ;;  %vm92_vm0 = vcmask 1044480   ;;  %vm43_vm1 = vcmask 39936   ;;  %v28_v3 = vld [vmem:[%s793_s1 + $0x8] sm:$0xff]  ;;  %v29_v4 = vld [vmem:[%s793_s1 + $0x10] sm:$0xff] }
   0x4   :  { %v27_v2 = vld [vmem:[%s793_s1] sm:$0xff]  ;;  %497 = vmatprep.subr.msk.mxu0 %vm92_vm0, %v26_v1  ;;  %v30_v5 = vld [vmem:[%s793_s1 + $0x18] sm:$0xff] }
   0x5   :  { %499 = vmatprep.mubr.msk.f32.mxu0 %vm43_vm1, %v27_v2  ;;  %498 = vmatpush3.msk.msra.mxu0 %vm92_vm0, %v26_v1  ;;  %v31_v6 = vld [vmem:[%s793_s1 + $0x20] sm:$0xff] }
   0x6   :  { %500 = vmatmul.mubr.msk.f32.vlgmr.msra.gmra.mrb[0].mxu0 %vm43_vm1, %v28_v3 }
   0x7   :  { %502 = vmatprep.mubr.msk.f32.mxu0 %vm43_vm1, %v29_v4 }
   0x8   :  { %13 = vsyncpa [#allocation4], 0  ;;  %v32_v7 = vld [vmem:[%s793_s1 + $0x28] sm:$0xff]  ;;  %v33_v8 = vld [vmem:[%s793_s1 + $0x30] sm:$0xff]  ;;  %v637_v22 = vmov 0   ;;  %vm402_vm2 = vcmask 64512  }
   0x9   :  { %v34_v9 = vld [vmem:[%s793_s1 + $0x38] sm:$0xff]  ;;  %v35_v10 = vld [vmem:[%s793_s1 + $0x40] sm:$0xff]  ;;  %v36_v11 = vld [vmem:[%s793_s1 + $0x48] sm:$0xff]  ;;  %611 = vset.pattern.permute.xlu0 %v637_v22  ;;  %612 = vset.pattern.permute.xlu1 %v637_v22  ;;  %vm427_vm3 = vcmask 57344  }
   0xa   :  { %503 = vmatmul.mubr.msk.f32.gmra.mrb[2].mxu0 %vm43_vm1, %v30_v5  ;;  %v37_v12 = vld [vmem:[%s793_s1 + $0x50] sm:$0xff]  ;;  %v38_v13 = vld [vmem:[%s793_s1 + $0x58] sm:$0xff]  ;;  %v39_v14 = vld [vmem:[%s793_s1 + $0x60] sm:$0xff] }
   0xb   :  { %505 = vmatprep.mubr.msk.f32.mxu0 %vm43_vm1, %v31_v6  ;;  %v40_v15 = vld [vmem:[%s793_s1 + $0x68] sm:$0xff]  ;;  %v41_v16 = vld [vmem:[%s793_s1 + $0x70] sm:$0xff]  ;;  %v42_v17 = vld [vmem:[%s793_s1 + $0x78] sm:$0xff] }
   0xc   :  { %v257_v18 = vld [vmem:[%s794_s2] sm:$0xff]  ;;  %v259_v19 = vld [vmem:[%s794_s2 + $0x10] sm:$0xff]  ;;  %v262_v23 = vld [vmem:[%s795_s3 + $0x8] sm:$0xff] }
   0xd   :  { %558 = vmatprep.mubr.f32.mxu1 %v259_v19  ;;  %v261_v20 = vld [vmem:[%s795_s3] sm:$0xff]  ;;  %v263_v21 = vld [vmem:[%s795_s3 + $0x10] sm:$0xff]  ;;  %v264_v24 = vld [vmem:[%s795_s3 + $0x18] sm:$0xff] }
   0xe   :  { %506 = vmatmul.mubr.msk.f32.gmra.mrb[4].mxu0 %vm43_vm1, %v32_v7  ;;  %267 = vperm.xlu0 %611, %v261_v20   ;;  %v374_v25 = vld [vmem:[%s796_s4] sm:$0xff]  ;;  %v375_v26 = vld [vmem:[%s796_s4 + $0x8] sm:$0xff]  ;;  %v376_v27 = vld [vmem:[%s796_s4 + $0x10] sm:$0xff] }
   0xf   :  { %508 = vmatprep.mubr.msk.f32.mxu0 %vm43_vm1, %v33_v8  ;;  %277 = vperm.xlu1 %612, %v263_v21   ;;  %v377_v28 = vld [vmem:[%s796_s4 + $0x18] sm:$0xff]  ;;  %v416_v29 = vld [vmem:[#allocation2] sm:$0x1]  ;;  %v258_v6 = vld [vmem:[%s794_s2 + $0x8] sm:$0xff] }
  0x10   :  { %v260_v7 = vld [vmem:[%s794_s2 + $0x18] sm:$0xff]  ;;  %s638_s2 = smov [#allocation3]  }
  0x11   :  { %s435_s26 = sshll.u32 %s638_s2, 4  ;;  %s436_s26 = int_to_ptr.vmem [resolvable:$true] %s435_s26 }
  0x12   :  { %509 = vmatmul.mubr.msk.f32.gmra.mrb[6].mxu0 %vm43_vm1, %v34_v9  ;;  %272 = vperm.xlu0 %611, %v262_v23   ;;  %s613_s27 = scalar_lea.vmem %s436_s26, 16  ;;  %s617_s28 = scalar_lea.vmem %s436_s26, 32 }
  0x13   :  { %511 = vmatprep.mubr.msk.f32.mxu0 %vm43_vm1, %v35_v10  ;;  %282 = vperm.xlu1 %612, %v264_v24   ;;  %p614_p0 = scmp.ne.s32.totalorder %s436_s26, %s613_s27  ;;  %p618_p1 = scmp.lt.s32.totalorder %s436_s26, %s436_s26 }
  0x14   :  { %p619_p2 = scmp.lt.s32.totalorder %s617_s28, %s613_s27 }
  0x16   :  { %512 = vmatmul.mubr.msk.f32.gmra.mrb[8].mxu0 %vm43_vm1, %v36_v11  ;;  %380 = vperm.xlu0 %611, %v374_v25   ;;  %p620_p3 = por %p619_p2, %p618_p1 }
  0x17   :  { %514 = vmatprep.mubr.msk.f32.mxu0 %vm43_vm1, %v37_v12  ;;  %385 = vperm.xlu1 %612, %v375_v26  }
  0x18   :  { %p621_p4 = pnand %p620_p3, %p614_p0 }
  0x1a   :  { %515 = vmatmul.mubr.msk.f32.gmra.mrb[10].mxu0 %vm43_vm1, %v38_v13  ;;  %390 = vperm.xlu0 %611, %v376_v27  }
  0x1b   :  { %517 = vmatprep.mubr.msk.f32.mxu0 %vm43_vm1, %v39_v14  ;;  %395 = vperm.xlu1 %612, %v377_v28  }
  0x1e   :  { %518 = vmatmul.mubr.msk.f32.gmra.mrb[12].mxu0 %vm43_vm1, %v40_v15  ;;  %419 = vperm.xlu0 %611, %v416_v29  }
  0x1f   :  { %520 = vmatprep.mubr.msk.f32.mxu0 %vm43_vm1, %v41_v16 }
  0x22   :  { %521 = vmatmul.mubr.msk.f32.gmra.mrb[14].mxu0 %vm43_vm1, %v42_v17 }
  0x23   :  { %555 = vmatprep.mubr.f32.mxu0 %v257_v18 }
  0x8d   :  { %v268_v8 = vpop.permute.xlu0 %267 }
  0x8e   :  { %v278_v9 = vpop.permute.xlu1 %277 }
  0x91   :  { %v273_v10 = vpop.permute.xlu0 %272 }
  0x92   :  { %v283_v11 = vpop.permute.xlu1 %282 }
  0x95   :  { %v381_v12 = vpop.permute.xlu0 %380 }
  0x96   :  { %v386_v13 = vpop.permute.xlu1 %385 }
  0x99   :  { %v391_v26 = vpop.permute.xlu0 %390 }
  0xd9   :  { %v501_v30 = vpop.f32.mrb[0].mxu0 }
  0xda   :  { %v242_v31 = vmax.f32 %v501_v30, 0.0  ;;  %v162_v32 = vpop.f32.mrb[1].mxu0  ;;  %v396_v30 = vpop.permute.xlu1 %395 }
  0xdb   :  { %v241_v33 = vmax.f32 %v162_v32, 0.0 }
  0xdd   :  { %v561_v34 = vpack.c.bf16 %v242_v31, %v241_v33  ;;  %v504_v35 = vpop.f32.mrb[2].mxu0 }
  0xde   :  { %v244_v36 = vmax.f32 %v504_v35, 0.0  ;;  %v172_v37 = vpop.f32.mrb[3].mxu0 }
  0xdf   :  { %v243_v38 = vmax.f32 %v172_v37, 0.0  ;;  %562 = vmatprep.subr.bf16.mxu0 %v561_v34  ;;  %593 = vmatprep.subr.bf16.mxu1 %v561_v34 }
  0xe0   :  { %564 = vmatpush3.bf16.msra.mxu0 %v561_v34  ;;  %601 = vmatpush3.bf16.msra.mxu1 %v561_v34 }
  0xe1   :  { %v565_v39 = vpack.c.bf16 %v244_v36, %v243_v38  ;;  %v507_v40 = vpop.f32.mrb[4].mxu0  ;;  %v422_v38 = vlaneseq }
  0xe2   :  { %v246_v41 = vmax.f32 %v507_v40, 0.0  ;;  %v182_v42 = vpop.f32.mrb[5].mxu0 }
  0xe3   :  { %v245_v43 = vmax.f32 %v182_v42, 0.0  ;;  %566 = vmatprep.subr.bf16.mxu0 %v565_v39  ;;  %594 = vmatprep.subr.bf16.mxu1 %v565_v39 }
  0xe4   :  { %568 = vmatpush3.bf16.msra.mxu0 %v565_v39  ;;  %602 = vmatpush3.bf16.msra.mxu1 %v565_v39 }
  0xe5   :  { %v569_v44 = vpack.c.bf16 %v246_v41, %v245_v43  ;;  %v510_v45 = vpop.f32.mrb[6].mxu0  ;;  %v423_v41 = vshrl.u32 %v422_v38, 7 }
  0xe6   :  { %v248_v46 = vmax.f32 %v510_v45, 0.0  ;;  %v192_v47 = vpop.f32.mrb[7].mxu0 }
  0xe7   :  { %v247_v48 = vmax.f32 %v192_v47, 0.0  ;;  %570 = vmatprep.subr.bf16.mxu0 %v569_v44  ;;  %595 = vmatprep.subr.bf16.mxu1 %v569_v44 }
  0xe8   :  { %572 = vmatpush3.bf16.msra.mxu0 %v569_v44  ;;  %603 = vmatpush3.bf16.msra.mxu1 %v569_v44  ;;  %v424_v44 = vsub.s32 0, %v423_v41 }
  0xe9   :  { %v573_v49 = vpack.c.bf16 %v248_v46, %v247_v48  ;;  %v513_v50 = vpop.f32.mrb[8].mxu0  ;;  %v420_v46 = vpop.permute.xlu0 %419 }
  0xea   :  { %v250_v51 = vmax.f32 %v513_v50, 0.0  ;;  %v202_v52 = vpop.f32.mrb[9].mxu0  ;;  %v425_v48 = vrot.slane %v420_v46, %v424_v44 }
  0xeb   :  { %v249_v53 = vmax.f32 %v202_v52, 0.0  ;;  %574 = vmatprep.subr.bf16.mxu0 %v573_v49  ;;  %596 = vmatprep.subr.bf16.mxu1 %v573_v49 }
  0xec   :  { %576 = vmatpush3.bf16.msra.mxu0 %v573_v49  ;;  %604 = vmatpush3.bf16.msra.mxu1 %v573_v49 }
  0xed   :  { %v577_v54 = vpack.c.bf16 %v250_v51, %v249_v53  ;;  %v516_v55 = vpop.f32.mrb[10].mxu0 }
  0xee   :  { %v252_v56 = vmax.f32 %v516_v55, 0.0  ;;  %v212_v57 = vpop.f32.mrb[11].mxu0 }
  0xef   :  { %v251_v58 = vmax.f32 %v212_v57, 0.0  ;;  %578 = vmatprep.subr.bf16.mxu0 %v577_v54  ;;  %597 = vmatprep.subr.bf16.mxu1 %v577_v54 }
  0xf0   :  { %580 = vmatpush3.bf16.msra.mxu0 %v577_v54  ;;  %605 = vmatpush3.bf16.msra.mxu1 %v577_v54 }
  0xf1   :  { %v581_v59 = vpack.c.bf16 %v252_v56, %v251_v58  ;;  %v519_v60 = vpop.f32.mrb[12].mxu0 }
  0xf2   :  { %v254_v61 = vmax.f32 %v519_v60, 0.0  ;;  %v222_v62 = vpop.f32.mrb[13].mxu0 }
  0xf3   :  { %v253_v63 = vmax.f32 %v222_v62, 0.0  ;;  %582 = vmatprep.subr.bf16.mxu0 %v581_v59  ;;  %598 = vmatprep.subr.bf16.mxu1 %v581_v59 }
  0xf4   :  { %584 = vmatpush3.bf16.msra.mxu0 %v581_v59  ;;  %606 = vmatpush3.bf16.msra.mxu1 %v581_v59 }
  0xf5   :  { %v585_v0 = vpack.c.bf16 %v254_v61, %v253_v63  ;;  %v522_v1 = vpop.f32.mrb[14].mxu0 }
  0xf6   :  { %v256_v2 = vmax.f32 %v522_v1, 0.0  ;;  %v232_v3 = vpop.f32.mrb[15].mxu0 }
  0xf7   :  { %v255_v4 = vmax.f32 %v232_v3, 0.0  ;;  %586 = vmatprep.subr.bf16.mxu0 %v585_v0  ;;  %599 = vmatprep.subr.bf16.mxu1 %v585_v0 }
  0xf8   :  { %588 = vmatpush3.bf16.msra.mxu0 %v585_v0  ;;  %607 = vmatpush3.bf16.msra.mxu1 %v585_v0 }
  0xf9   :  { %v589_v5 = vpack.c.bf16 %v256_v2, %v255_v4 }
  0xfb   :  { %590 = vmatprep.subr.bf16.mxu0 %v589_v5  ;;  %600 = vmatprep.subr.bf16.mxu1 %v589_v5 }
  0xfc   :  { %592 = vmatpush3.bf16.msra.mxu0 %v589_v5  ;;  %608 = vmatpush3.bf16.msra.mxu1 %v589_v5 }
  0xff   :  { %556 = vmatmul.mubr.f32.vlgmr.msra.gmra.mrb[16].mxu0 %v258_v6  ;;  %559 = vmatmul.mubr.f32.vlgmr.msra.gmra.mrb[0].mxu1 %v260_v7 }
 0x1d2   :  { %v557_v14 = vpop.f32.mrb[16].mxu0  ;;  %v560_v15 = vpop.f32.mrb[0].mxu1 }
 0x1d3   :  { %v357_v16 = vadd.f32 %v557_v14, %v273_v10  ;;  %v367_v17 = vadd.f32 %v560_v15, %v283_v11  ;;  %v351_v18 = vpop.f32.mrb[17].mxu0  ;;  %v361_v19 = vpop.f32.mrb[1].mxu1 }
 0x1d4   :  { %v352_v20 = vadd.f32 %v351_v18, %v268_v8  ;;  %v362_v21 = vadd.f32 %v361_v19, %v278_v9 }
 0x1d5   :  { %v371_v22 = vmax.f32 %v357_v16, 0.0  ;;  %v373_v23 = vmax.f32 %v367_v17, 0.0 }
 0x1d6   :  { %v370_v24 = vmax.f32 %v352_v20, 0.0  ;;  %v372_v25 = vmax.f32 %v362_v21, 0.0 }
 0x1d7   :  { %v399_v27 = vmul.f32 %v386_v13, %v371_v22  ;;  %v401_v32 = vmul.f32 %v396_v30, %v373_v23 }
 0x1d8   :  { %v398_v28 = vmul.f32 %v381_v12, %v370_v24  ;;  %v400_v29 = vmul.f32 %v391_v26, %v372_v25 }
 0x1d9   :  { %v404_v31 = vsel %vm402_vm2, %v399_v27, 0.0  ;;  %v408_v37 = vsel %vm402_vm2, %v401_v32, 0.0 }
 0x1da   :  { %v403_v33 = vsel %vm402_vm2, %v398_v28, 0.0  ;;  %v406_v35 = vsel %vm402_vm2, %v400_v29, 0.0 }
 0x1db   :  { %v405_v34 = vadd.f32 %v404_v31, %v403_v33 }
 0x1dd   :  { %v407_v36 = vadd.f32 %v406_v35, %v405_v34 }
 0x1df   :  { %v409_v39 = vadd.f32 %v408_v37, %v407_v36 }
 0x1e1   :  { %v410_v40 = vrot.slane %v409_v39, 4 }
 0x1e3   :  { %v411_v42 = vadd.f32 %v410_v40, %v409_v39 }
 0x1e5   :  { %v412_v43 = vrot.slane %v411_v42, 2 }
 0x1e7   :  { %v413_v45 = vadd.f32 %v412_v43, %v411_v42 }
 0x1e9   :  { %v414_v47 = vrot.slane %v413_v45, 1 }
 0x1eb   :  { %v415_v49 = vadd.f32 %v414_v47, %v413_v45 }
 0x1ed   :  { %v426_v50 = vadd.f32 %v425_v48, %v415_v49 }
 0x1ef   :  { %428 = vst.msk [vmem:[#allocation3] sm:$0x1] %vm427_vm3, %v426_v50 }
 0x1f0   :  { %624 = shalt.err (!%p621_p4)
}
 0x1f1   :  { %s625_s0 = scalar_lea.hbm %s798_s6, 16 }
 0x1f2   :  { %p626_p5 = scmp.ne.s32.totalorder %s798_s6, %s625_s0  ;;  %p629_p6 = scmp.lt.u32.totalorder %s625_s0, %s798_s6 }
 0x1f4   :  { %p631_p7 = pnand %p629_p6, %p626_p5 }
 0x1f6   :  { %634 = shalt.err (!%p631_p7)
}
 0x1f7   :  { %438 = dma.vmem_to_hbm [thread:$0]  %s436_s26, 16, %s798_s6, [#allocation4]  }
 0x1f8   :  { %635 = dma.done.wait [#allocation4], 16  }
 0x1f9   :  { %636 = vsyncadd [#allocation4], 4294967280 }
 0x1fa   :  { %442 = vsyncpa [#allocation4], 1 }

</bundles_post_ra>
